<compile_context>
chip_gen: v7x
topology: tpu7x:2x2x1
jax: 0.10.0
libtpu: 0.0.40
codegen_flags: <defaults>
</compile_context>

<pallas_src>
import functools

import jax
import jax.numpy as jnp
from jax.experimental import pallas as pl
from jax.experimental.pallas import tpu as pltpu

EPS = 1e-5
EXPANSION = 4


# ----------------------------------------------------------------------------- kernel
def _binmm_bn_kernel(p_ref, w_ref, scale_ref, shift_ref, *rest,
                     apply_hardtanh, add_residual):
    """Fused: (±1 bf16 patches) @ (±1 bf16 weights) -> folded alpha*BN -> (+res) -> hardtanh."""
    if add_residual:
        res_ref, o_ref = rest
    else:
        (o_ref,) = rest

    # MXU matmul: bf16 x bf16 operands, f32 accumulation (conv via im2col).
    acc = jnp.dot(p_ref[...], w_ref[...], preferred_element_type=jnp.float32)
    out = acc * scale_ref[...] + shift_ref[...]          # alpha folded into BN scale on host
    if add_residual:
        out = out + res_ref[...].astype(jnp.float32)
    if apply_hardtanh:
        out = jnp.clip(out, -1.0, 1.0)
    o_ref[...] = out.astype(o_ref.dtype)


# ----------------------------------------------------------------------------- glue
def _round_up(x, m):
    return (x + m - 1) // m * m


def _im2col(x_nhwc, ksize, stride, pad):
    """Returns (patches (M, kh*kw*C), (N, Ho, Wo)).  Patch col order = (kh, kw, C)."""
    N, H, W, C = x_nhwc.shape
    xp = jnp.pad(x_nhwc, ((0, 0), (pad, pad), (pad, pad), (0, 0)))
    Ho = (H + 2 * pad - ksize) // stride + 1
    Wo = (W + 2 * pad - ksize) // stride + 1
    cols = []
    for i in range(ksize):
        for j in range(ksize):
            cols.append(xp[:, i:i + Ho * stride:stride, j:j + Wo * stride:stride, :])
    patches = jnp.concatenate(cols, axis=-1)             # (N, Ho, Wo, kh*kw*C)
    return patches.reshape(N * Ho * Wo, ksize * ksize * C), (N, Ho, Wo)


def bin_conv_bn(x_nhwc, weight, alpha, bn, *, stride, ksize, pad,
                hardtanh, residual=None, out_dtype=jnp.float32):
    """BinarizeConv2d + eval-mode BatchNorm (+residual) (+hardtanh) via one pallas_call."""
    Cout, Cin, kh, kw = weight.shape
    K = kh * kw * Cin

    # --- binarization hoisted out of the kernel (fuses with im2col/pad in XLA) ------------
    # ba = sign(a): sign is invariant to the positive per-sample rescale; ±1/0 exact in bf16.
    xb = jnp.sign(x_nhwc).astype(jnp.bfloat16)
    patches, (N, Ho, Wo) = _im2col(xb, ksize, stride, pad)
    M = patches.shape[0]

    # bw = sign(w - mean over (cin,kh,kw)); tau=1.0 => clamp is a no-op, rescale is positive.
    w_mean = jnp.mean(weight, axis=(1, 2, 3), keepdims=True)
    bw = jnp.sign(weight - w_mean)
    wmat = jnp.transpose(bw, (2, 3, 1, 0)).reshape(K, Cout).astype(jnp.bfloat16)

    # --- fold alpha into the eval-mode BatchNorm affine -----------------------------------
    gamma, beta, rmean, rvar = bn
    bn_scale = gamma / jnp.sqrt(rvar + EPS)
    scale = (alpha * bn_scale).astype(jnp.float32)        # BN(alpha*y) = y*(alpha*scale)+shift
    shift = (beta - rmean * bn_scale).astype(jnp.float32)

    # --- pad to lane/tile-friendly shapes --------------------------------------------------
    Cout_p = _round_up(Cout, 128)                         # lane-dense output stores, full MXU N
    tm = min(512, _round_up(M, 8))                        # large M tiles amortize grid overhead
    out_bytes = jnp.dtype(out_dtype).itemsize
    res_bytes = 4 if residual is not None else 0

    def vmem_est(t):                                      # double-buffered working set
        return (2 * t * K * 2 + 2 * K * Cout_p * 2 + 2 * t * Cout_p * out_bytes
                + 2 * t * Cout_p * res_bytes + 4 * Cout_p * 4)

    while tm > 128 and vmem_est(tm) > 12 * 1024 * 1024:   # stay under scoped-VMEM default (v5e)
        tm //= 2
    M_p = _round_up(M, tm)

    patches = jnp.pad(patches, ((0, M_p - M), (0, 0)))
    wmat = jnp.pad(wmat, ((0, 0), (0, Cout_p - Cout)))
    scale2 = jnp.pad(scale.reshape(1, Cout), ((0, 0), (0, Cout_p - Cout)))
    shift2 = jnp.pad(shift.reshape(1, Cout), ((0, 0), (0, Cout_p - Cout)))

    in_specs = [
        pl.BlockSpec((tm, K), lambda i: (i, 0)),          # ±1 bf16 patches, tiled over M
        pl.BlockSpec((K, Cout_p), lambda i: (0, 0)),      # ±1 bf16 weight matrix, resident
        pl.BlockSpec((1, Cout_p), lambda i: (0, 0)),      # folded alpha*BN scale
        pl.BlockSpec((1, Cout_p), lambda i: (0, 0)),      # BN shift
    ]
    args = [patches, wmat, scale2, shift2]
    if residual is not None:
        res = residual.reshape(M, Cout).astype(jnp.float32)
        res = jnp.pad(res, ((0, M_p - M), (0, Cout_p - Cout)))
        args.append(res)
        in_specs.append(pl.BlockSpec((tm, Cout_p), lambda i: (i, 0)))

    kernel = functools.partial(_binmm_bn_kernel,
                               apply_hardtanh=hardtanh,
                               add_residual=residual is not None)

    out = pl.pallas_call(
        kernel,
        grid=(M_p // tm,),
        in_specs=in_specs,
        out_specs=pl.BlockSpec((tm, Cout_p), lambda i: (i, 0)),
        out_shape=jax.ShapeDtypeStruct((M_p, Cout_p), out_dtype),
        compiler_params=pltpu.CompilerParams(dimension_semantics=("parallel",)),
    )(*args)
    return out[:M, :Cout].reshape(N, Ho, Wo, Cout)


# ----------------------------------------------------------------------------- module
def init_params(key, in_planes, planes, stride):
    out_planes = EXPANSION * planes
    ks = jax.random.split(key, 16)

    def conv_params(kw_, kb, cout, cin, ksize):
        w = jax.random.normal(kw_, (cout, cin, ksize, ksize), jnp.float32) * 0.1
        alpha = jax.random.uniform(kb, (cout,), jnp.float32)          # torch.rand(cout,1,1)
        return w, alpha

    def bn_params(k, c):
        k1, k2, k3, k4 = jax.random.split(k, 4)
        gamma = jax.random.uniform(k1, (c,), jnp.float32, 0.5, 1.5)
        beta = 0.1 * jax.random.normal(k2, (c,), jnp.float32)
        rmean = 0.1 * jax.random.normal(k3, (c,), jnp.float32)
        rvar = jax.random.uniform(k4, (c,), jnp.float32, 0.5, 1.5)
        return gamma, beta, rmean, rvar

    p = {
        "conv1": conv_params(ks[0], ks[1], planes, in_planes, 1),
        "bn1": bn_params(ks[2], planes),
        "conv2": conv_params(ks[3], ks[4], planes, planes, 3),
        "bn2": bn_params(ks[5], planes),
        "conv3": conv_params(ks[6], ks[7], out_planes, planes, 1),
        "bn3": bn_params(ks[8], out_planes),
    }
    if stride != 1 or in_planes != out_planes:
        p["conv_sc"] = conv_params(ks[9], ks[10], out_planes, in_planes, 1)
        p["bn_sc"] = bn_params(ks[11], out_planes)
    return p


def bottleneck_1w1a_forward(x_nchw, params, *, stride):
    x = jnp.transpose(x_nchw, (0, 2, 3, 1))  # NCHW -> NHWC

    # shortcut branch (kept f32: it feeds the final residual add, not just a sign())
    if "conv_sc" in params:
        w_sc, a_sc = params["conv_sc"]
        shortcut = bin_conv_bn(x, w_sc, a_sc, params["bn_sc"],
                               stride=stride, ksize=1, pad=0, hardtanh=False,
                               out_dtype=jnp.float32)
    else:
        shortcut = x

    # intermediate activations as bf16: the next conv only consumes sign(), so lossless.
    w1, a1 = params["conv1"]
    out = bin_conv_bn(x, w1, a1, params["bn1"],
                      stride=1, ksize=1, pad=0, hardtanh=True, out_dtype=jnp.bfloat16)

    w2, a2 = params["conv2"]
    out = bin_conv_bn(out, w2, a2, params["bn2"],
                      stride=stride, ksize=3, pad=1, hardtanh=True, out_dtype=jnp.bfloat16)

    w3, a3 = params["conv3"]
    out = bin_conv_bn(out, w3, a3, params["bn3"],
                      stride=1, ksize=1, pad=0, hardtanh=True, residual=shortcut,
                      out_dtype=jnp.float32)

    return jnp.transpose(out, (0, 3, 1, 2))  # NHWC -> NCHW


# ----------------------------------------------------------------------------- main
if __name__ == "__main__":
    key = jax.random.PRNGKey(0)
    k_x, k_p = jax.random.split(key)

    N, in_planes, H, W = 2, 4, 16, 16
    planes, stride = 4, 1                      # out channels = EXPANSION*planes = 16

    x = jax.random.normal(k_x, (N, in_planes, H, W), jnp.float32)
    params = init_params(k_p, in_planes, planes, stride)

    y = bottleneck_1w1a_forward(x, params, stride=stride)
    jax.block_until_ready(y)
    assert y.shape == (N, EXPANSION * planes, H // stride, W // stride)
    assert bool(jnp.all(jnp.abs(y) <= 1.0 + 1e-6))   # final hardtanh
    print("KERNEL_OK")
</pallas_src>

<mosaic_0001>
module attributes {stable_mosaic.version = 11 : i64} {
  func.func @_binmm_bn_kernel(%arg0: i32, %arg1: memref<512x4xbf16, #tpu.memory_space<vmem>>, %arg2: memref<4x128xbf16, #tpu.memory_space<vmem>>, %arg3: memref<1x128xf32, #tpu.memory_space<vmem>>, %arg4: memref<1x128xf32, #tpu.memory_space<vmem>>, %arg5: memref<512x128xf32, #tpu.memory_space<vmem>>) attributes {dimension_semantics = [#tpu.dimension_semantics<parallel>], iteration_bounds = array<i64: 1>, scalar_prefetch = 0 : i64, scratch_operands = 0 : i64, tpu.core_type = #tpu.core_type<tc>, window_params = [{transform_indices = @transform_0, window_bounds = array<i64: 512, 4>}, {pipeline_mode = #tpu.pipeline_mode<synchronous>, transform_indices = @transform_1, window_bounds = array<i64: 4, 128>}, {pipeline_mode = #tpu.pipeline_mode<synchronous>, transform_indices = @transform_2, window_bounds = array<i64: 1, 128>}, {pipeline_mode = #tpu.pipeline_mode<synchronous>, transform_indices = @transform_3, window_bounds = array<i64: 1, 128>}, {transform_indices = @transform_4, window_bounds = array<i64: 512, 128>}]} {
    %c0 = arith.constant 0 : index
    %c0_0 = arith.constant 0 : index
    %0 = vector.load %arg1[%c0, %c0_0] : memref<512x4xbf16, #tpu.memory_space<vmem>>, vector<512x4xbf16>
    %c0_1 = arith.constant 0 : index
    %c0_2 = arith.constant 0 : index
    %1 = vector.load %arg2[%c0_1, %c0_2] : memref<4x128xbf16, #tpu.memory_space<vmem>>, vector<4x128xbf16>
    %cst = arith.constant dense<0.000000e+00> : vector<512x128xf32>
    %2 = tpu.matmul %0, %1, %cst {dimension_numbers = #tpu.dot_dimension_numbers<[1], [0], [0], [1], [0, 0, 1, 1], [], []>} : vector<512x4xbf16>, vector<4x128xbf16>, vector<512x128xf32> -> vector<512x128xf32>
    %c0_3 = arith.constant 0 : index
    %c0_4 = arith.constant 0 : index
    %3 = vector.load %arg3[%c0_3, %c0_4] : memref<1x128xf32, #tpu.memory_space<vmem>>, vector<1x128xf32>
    %4 = vector.broadcast %3 : vector<1x128xf32> to vector<512x128xf32>
    %5 = arith.mulf %2, %4 : vector<512x128xf32>
    %c0_5 = arith.constant 0 : index
    %c0_6 = arith.constant 0 : index
    %6 = vector.load %arg4[%c0_5, %c0_6] : memref<1x128xf32, #tpu.memory_space<vmem>>, vector<1x128xf32>
    %7 = vector.broadcast %6 : vector<1x128xf32> to vector<512x128xf32>
    %8 = arith.addf %5, %7 : vector<512x128xf32>
    %c0_7 = arith.constant 0 : index
    %c0_8 = arith.constant 0 : index
    %9 = vector.load %arg5[%c0_7, %c0_8] : memref<512x128xf32, #tpu.memory_space<vmem>>, vector<512x128xf32>
    tpu.vector_store %arg5[%c0_7, %c0_8], %8 {strides = array<i32>} : memref<512x128xf32, #tpu.memory_space<vmem>>, vector<512x128xf32>,
    return
  }
  func.func @transform_0(%arg0: i32) -> (i32, i32) {
    %c0_i32 = arith.constant 0 : i32
    %c0_i32_0 = arith.constant 0 : i32
    return %arg0, %c0_i32 : i32, i32
  }
  func.func @transform_1(%arg0: i32) -> (i32, i32) {
    %c0_i32 = arith.constant 0 : i32
    %c0_i32_0 = arith.constant 0 : i32
    %c0_i32_1 = arith.constant 0 : i32
    return %c0_i32, %c0_i32_0 : i32, i32
  }
  func.func @transform_2(%arg0: i32) -> (i32, i32) {
    %c0_i32 = arith.constant 0 : i32
    %c0_i32_0 = arith.constant 0 : i32
    %c0_i32_1 = arith.constant 0 : i32
    return %c0_i32, %c0_i32_0 : i32, i32
  }
  func.func @transform_3(%arg0: i32) -> (i32, i32) {
    %c0_i32 = arith.constant 0 : i32
    %c0_i32_0 = arith.constant 0 : i32
    %c0_i32_1 = arith.constant 0 : i32
    return %c0_i32, %c0_i32_0 : i32, i32
  }
  func.func @transform_4(%arg0: i32) -> (i32, i32) {
    %c0_i32 = arith.constant 0 : i32
    %c0_i32_0 = arith.constant 0 : i32
    return %arg0, %c0_i32 : i32, i32
  }
}

</mosaic_0001>

<bundles_post_ra>
// kernel: tpu_custom_call.1
= control target key start
LH: loop header
LB: loop body
LE: loop exit
PB: predicated region body
PF: predicated region fallthrough
CT: control target
= control target key end

     0   :  { %vm341_vm0 = vcmask 1041408   ;;  %vm244_vm1 = vcmask 31744   ;;  %s1393_s0 = inlined_call_operand.vmem [shape: bf16[512,4], index: 0, kind: input, shape index: {}]   ;;  %s1394_s1 = inlined_call_operand.vmem [shape: bf16[4,128], index: 1, kind: input, shape index: {}]   ;;  %s1395_s2 = inlined_call_operand.vmem [shape: f32[1,128], index: 2, kind: input, shape index: {}]   ;;  %s1396_s3 = inlined_call_operand.vmem [shape: f32[1,128], index: 3, kind: input, shape index: {}]   ;;  %s1397_s4 = inlined_call_operand.hbm [shape: f32[512,128], index: 4, kind: output, shape index: {}]  }
   0x1   :  { %v83_v0 = vld [vmem:[%s1394_s1] sm:$0x3]  ;;  %v1030_v4 = vld [vmem:[%s1393_s0 + $0x8] sm:$0xff]   ;;  %v1032_v6 = vld [vmem:[%s1393_s0 + $0x10] sm:$0xff]  }
   0x2   :  { %v1028_v1 = vld [vmem:[%s1393_s0] sm:$0xff]   ;;  %1023 = vmatprep.subr.msk.bf16.mxu0 %vm341_vm0, %v83_v0  ;;  %1024 = vmatprep.subr.msk.bf16.mxu1 %vm341_vm0, %v83_v0  ;;  %v343_v2 = vsel %vm341_vm0, %v83_v0, 0  ;;  %v1031_v5 = vld [vmem:[%s1393_s0 + $0x88] sm:$0xff]   ;;  %v1033_v7 = vld [vmem:[%s1393_s0 + $0x90] sm:$0xff]  }
   0x3   :  { %956 = vmatpush3.bf16.msra.mxu0 %v343_v2  ;;  %1022 = vmatpush3.bf16.msra.mxu1 %v343_v2  ;;  %v1029_v3 = vld [vmem:[%s1393_s0 + $0x80] sm:$0xff]   ;;  %v1034_v8 = vld [vmem:[%s1393_s0 + $0x18] sm:$0xff]   ;;  %v1038_v12 = vld [vmem:[%s1393_s0 + $0x28] sm:$0xff]  }
   0x4   :  { %957 = vmatprep.mubr.msk.bf16.mxu0 %vm244_vm1, %v1028_v1  ;;  %989 = vmatprep.mubr.msk.bf16.mxu1 %vm244_vm1, %v1029_v3  ;;  %v1035_v9 = vld [vmem:[%s1393_s0 + $0x98] sm:$0xff]   ;;  %v1036_v10 = vld [vmem:[%s1393_s0 + $0x20] sm:$0xff]   ;;  %v1039_v13 = vld [vmem:[%s1393_s0 + $0xa8] sm:$0xff]  }
   0x5   :  { %v1037_v11 = vld [vmem:[%s1393_s0 + $0xa0] sm:$0xff]   ;;  %v1040_v14 = vld [vmem:[%s1393_s0 + $0x30] sm:$0xff]   ;;  %v1042_v16 = vld [vmem:[%s1393_s0 + $0x38] sm:$0xff]  }
   0x6   :  { %958 = vmatmul.mubr.msk.bf16.vlgmr.msra.gmra.mrb[0].mxu0 %vm244_vm1, %v1030_v4  ;;  %990 = vmatmul.mubr.msk.bf16.vlgmr.msra.gmra.mrb[0].mxu1 %vm244_vm1, %v1031_v5  ;;  %v1041_v15 = vld [vmem:[%s1393_s0 + $0xb0] sm:$0xff]   ;;  %v1043_v17 = vld [vmem:[%s1393_s0 + $0xb8] sm:$0xff]   ;;  %v1044_v18 = vld [vmem:[%s1393_s0 + $0x40] sm:$0xff]  }
   0x7   :  { %961 = vmatprep.mubr.msk.bf16.mxu0 %vm244_vm1, %v1032_v6  ;;  %993 = vmatprep.mubr.msk.bf16.mxu1 %vm244_vm1, %v1033_v7  ;;  %v1045_v19 = vld [vmem:[%s1393_s0 + $0xc0] sm:$0xff]  }
   0xe   :  { %962 = vmatmul.mubr.msk.bf16.gmra.mrb[4].mxu0 %vm244_vm1, %v1034_v8  ;;  %994 = vmatmul.mubr.msk.bf16.gmra.mrb[4].mxu1 %vm244_vm1, %v1035_v9 }
   0xf   :  { %965 = vmatprep.mubr.msk.bf16.mxu0 %vm244_vm1, %v1036_v10  ;;  %997 = vmatprep.mubr.msk.bf16.mxu1 %vm244_vm1, %v1037_v11 }
  0x16   :  { %966 = vmatmul.mubr.msk.bf16.gmra.mrb[8].mxu0 %vm244_vm1, %v1038_v12  ;;  %998 = vmatmul.mubr.msk.bf16.gmra.mrb[8].mxu1 %vm244_vm1, %v1039_v13 }
  0x17   :  { %969 = vmatprep.mubr.msk.bf16.mxu0 %vm244_vm1, %v1040_v14  ;;  %1001 = vmatprep.mubr.msk.bf16.mxu1 %vm244_vm1, %v1041_v15 }
  0x1e   :  { %970 = vmatmul.mubr.msk.bf16.gmra.mrb[12].mxu0 %vm244_vm1, %v1042_v16  ;;  %1002 = vmatmul.mubr.msk.bf16.gmra.mrb[12].mxu1 %vm244_vm1, %v1043_v17 }
  0x1f   :  { %973 = vmatprep.mubr.msk.bf16.mxu0 %vm244_vm1, %v1044_v18  ;;  %1005 = vmatprep.mubr.msk.bf16.mxu1 %vm244_vm1, %v1045_v19 }
  0x20   :  { %9 = vsyncpa [#allocation3], 0  ;;  %v1046_v20 = vld [vmem:[%s1393_s0 + $0x48] sm:$0xff]   ;;  %v1048_v22 = vld [vmem:[%s1393_s0 + $0x50] sm:$0xff]  }
  0x21   :  { %v1047_v21 = vld [vmem:[%s1393_s0 + $0xc8] sm:$0xff]   ;;  %v1049_v23 = vld [vmem:[%s1393_s0 + $0xd0] sm:$0xff]   ;;  %v1050_v24 = vld [vmem:[%s1393_s0 + $0x58] sm:$0xff]  }
  0x22   :  { %v1051_v25 = vld [vmem:[%s1393_s0 + $0xd8] sm:$0xff]   ;;  %v1052_v26 = vld [vmem:[%s1393_s0 + $0x60] sm:$0xff]   ;;  %v1054_v28 = vld [vmem:[%s1393_s0 + $0x68] sm:$0xff]  }
  0x23   :  { %v1053_v27 = vld [vmem:[%s1393_s0 + $0xe0] sm:$0xff]   ;;  %v1055_v29 = vld [vmem:[%s1393_s0 + $0xe8] sm:$0xff]   ;;  %v1056_v30 = vld [vmem:[%s1393_s0 + $0x70] sm:$0xff]  }
  0x24   :  { %v1057_v31 = vld [vmem:[%s1393_s0 + $0xf0] sm:$0xff]   ;;  %v1058_v32 = vld [vmem:[%s1393_s0 + $0x78] sm:$0xff]   ;;  %v1246_v34 = vld [vmem:[%s1395_s2] ss:$0 sm:$0xff] }
  0x25   :  { %v1059_v33 = vld [vmem:[%s1393_s0 + $0xf8] sm:$0xff]   ;;  %v1251_v36 = vld [vmem:[%s1396_s3] ss:$0 sm:$0xff]  ;;  %s1084_s0 = smov [#allocation2]  }
  0x26   :  { %974 = vmatmul.mubr.msk.bf16.gmra.mrb[16].mxu0 %vm244_vm1, %v1046_v20  ;;  %1006 = vmatmul.mubr.msk.bf16.gmra.mrb[16].mxu1 %vm244_vm1, %v1047_v21  ;;  %s845_s2 = sshll.u32 %s1084_s0, 4  ;;  %s846_s2 = int_to_ptr.vmem [resolvable:$true] %s845_s2 }
  0x27   :  { %977 = vmatprep.mubr.msk.bf16.mxu0 %vm244_vm1, %v1048_v22  ;;  %1009 = vmatprep.mubr.msk.bf16.mxu1 %vm244_vm1, %v1049_v23  ;;  %s1060_s3 = scalar_lea.vmem %s846_s2, 8192  ;;  %p1065_p1 = scmp.lt.s32.totalorder %s846_s2, %s846_s2 }
  0x28   :  { %p1061_p0 = scmp.ne.s32.totalorder %s846_s2, %s1060_s3  ;;  %p1066_p2 = scmp.lt.s32.totalorder %s1060_s3, %s1060_s3 }
  0x2a   :  { %p1067_p3 = por %p1066_p2, %p1065_p1 }
  0x2c   :  { %p1068_p4 = pnand %p1067_p3, %p1061_p0 }
  0x2e   :  { %978 = vmatmul.mubr.msk.bf16.gmra.mrb[20].mxu0 %vm244_vm1, %v1050_v24  ;;  %1010 = vmatmul.mubr.msk.bf16.gmra.mrb[20].mxu1 %vm244_vm1, %v1051_v25 }
  0x2f   :  { %981 = vmatprep.mubr.msk.bf16.mxu0 %vm244_vm1, %v1052_v26  ;;  %1013 = vmatprep.mubr.msk.bf16.mxu1 %vm244_vm1, %v1053_v27 }
  0x36   :  { %982 = vmatmul.mubr.msk.bf16.gmra.mrb[24].mxu0 %vm244_vm1, %v1054_v28  ;;  %1014 = vmatmul.mubr.msk.bf16.gmra.mrb[24].mxu1 %vm244_vm1, %v1055_v29 }
  0x37   :  { %985 = vmatprep.mubr.msk.bf16.mxu0 %vm244_vm1, %v1056_v30  ;;  %1017 = vmatprep.mubr.msk.bf16.mxu1 %vm244_vm1, %v1057_v31 }
  0x3e   :  { %986 = vmatmul.mubr.msk.bf16.gmra.mrb[28].mxu0 %vm244_vm1, %v1058_v32  ;;  %1018 = vmatmul.mubr.msk.bf16.gmra.mrb[28].mxu1 %vm244_vm1, %v1059_v33 }
  0xd9   :  { %v959_v35 = vpop.f32.mrb[0].mxu0  ;;  %v991_v38 = vpop.f32.mrb[0].mxu1 }
  0xda   :  { %v643_v37 = vmul.f32 %v959_v35, %v1246_v34  ;;  %v379_v39 = vpop.f32.mrb[1].mxu0  ;;  %v675_v40 = vmul.f32 %v991_v38, %v1246_v34  ;;  %v507_v42 = vpop.f32.mrb[1].mxu1 }
  0xdb   :  { %v641_v41 = vmul.f32 %v1246_v34, %v379_v39  ;;  %v960_v43 = vpop.f32.mrb[2].mxu0  ;;  %v673_v45 = vmul.f32 %v1246_v34, %v507_v42  ;;  %v992_v47 = vpop.f32.mrb[2].mxu1 }
  0xdc   :  { %v714_v44 = vadd.f32 %v1251_v36, %v643_v37  ;;  %v644_v46 = vmul.f32 %v960_v43, %v1246_v34  ;;  %v382_v48 = vpop.f32.mrb[3].mxu0  ;;  %v746_v49 = vadd.f32 %v1251_v36, %v675_v40  ;;  %v676_v51 = vmul.f32 %v992_v47, %v1246_v34  ;;  %v510_v53 = vpop.f32.mrb[3].mxu1 }
  0xdd   :  { %v712_v50 = vadd.f32 %v1251_v36, %v641_v41  ;;  %v642_v52 = vmul.f32 %v1246_v34, %v382_v48  ;;  %v744_v54 = vadd.f32 %v1251_v36, %v673_v45  ;;  %v674_v56 = vmul.f32 %v1246_v34, %v510_v53 }
  0xde   :  { %778 = vst [vmem:[#allocation2 + $0x10] sm:$0xff] %v714_v44  ;;  %v715_v55 = vadd.f32 %v1251_v36, %v644_v46  ;;  %810 = vst [vmem:[#allocation2 + $0x110] sm:$0xff] %v746_v49  ;;  %v747_v57 = vadd.f32 %v1251_v36, %v676_v51 }
  0xdf   :  { %776 = vst [vmem:[#allocation2] sm:$0xff] %v712_v50  ;;  %v713_v58 = vadd.f32 %v1251_v36, %v642_v52  ;;  %808 = vst [vmem:[#allocation2 + $0x100] sm:$0xff] %v744_v54  ;;  %v745_v59 = vadd.f32 %v1251_v36, %v674_v56 }
  0xe0   :  { %779 = vst [vmem:[#allocation2 + $0x18] sm:$0xff] %v715_v55  ;;  %811 = vst [vmem:[#allocation2 + $0x118] sm:$0xff] %v747_v57 }
  0xe1   :  { %777 = vst [vmem:[#allocation2 + $0x8] sm:$0xff] %v713_v58  ;;  %v963_v60 = vpop.f32.mrb[4].mxu0  ;;  %809 = vst [vmem:[#allocation2 + $0x108] sm:$0xff] %v745_v59  ;;  %v995_v62 = vpop.f32.mrb[4].mxu1 }
  0xe2   :  { %v647_v61 = vmul.f32 %v963_v60, %v1246_v34  ;;  %v395_v63 = vpop.f32.mrb[5].mxu0  ;;  %v679_v0 = vmul.f32 %v995_v62, %v1246_v34  ;;  %v523_v2 = vpop.f32.mrb[5].mxu1 }
  0xe3   :  { %v645_v1 = vmul.f32 %v1246_v34, %v395_v63  ;;  %v964_v3 = vpop.f32.mrb[6].mxu0  ;;  %v677_v5 = vmul.f32 %v1246_v34, %v523_v2  ;;  %v996_v7 = vpop.f32.mrb[6].mxu1 }
  0xe4   :  { %v718_v4 = vadd.f32 %v1251_v36, %v647_v61  ;;  %v648_v6 = vmul.f32 %v964_v3, %v1246_v34  ;;  %v398_v8 = vpop.f32.mrb[7].mxu0  ;;  %v750_v9 = vadd.f32 %v1251_v36, %v679_v0  ;;  %v680_v11 = vmul.f32 %v996_v7, %v1246_v34  ;;  %v526_v13 = vpop.f32.mrb[7].mxu1 }
  0xe5   :  { %v716_v10 = vadd.f32 %v1251_v36, %v645_v1  ;;  %v646_v12 = vmul.f32 %v1246_v34, %v398_v8  ;;  %v748_v14 = vadd.f32 %v1251_v36, %v677_v5  ;;  %v678_v16 = vmul.f32 %v1246_v34, %v526_v13 }
  0xe6   :  { %782 = vst [vmem:[#allocation2 + $0x30] sm:$0xff] %v718_v4  ;;  %v719_v15 = vadd.f32 %v1251_v36, %v648_v6  ;;  %814 = vst [vmem:[#allocation2 + $0x130] sm:$0xff] %v750_v9  ;;  %v751_v17 = vadd.f32 %v1251_v36, %v680_v11 }
  0xe7   :  { %780 = vst [vmem:[#allocation2 + $0x20] sm:$0xff] %v716_v10  ;;  %v717_v18 = vadd.f32 %v1251_v36, %v646_v12  ;;  %812 = vst [vmem:[#allocation2 + $0x120] sm:$0xff] %v748_v14  ;;  %v749_v19 = vadd.f32 %v1251_v36, %v678_v16 }
  0xe8   :  { %783 = vst [vmem:[#allocation2 + $0x38] sm:$0xff] %v719_v15  ;;  %815 = vst [vmem:[#allocation2 + $0x138] sm:$0xff] %v751_v17 }
  0xe9   :  { %781 = vst [vmem:[#allocation2 + $0x28] sm:$0xff] %v717_v18  ;;  %v967_v20 = vpop.f32.mrb[8].mxu0  ;;  %813 = vst [vmem:[#allocation2 + $0x128] sm:$0xff] %v749_v19  ;;  %v999_v22 = vpop.f32.mrb[8].mxu1 }
  0xea   :  { %v651_v21 = vmul.f32 %v967_v20, %v1246_v34  ;;  %v411_v23 = vpop.f32.mrb[9].mxu0  ;;  %v683_v24 = vmul.f32 %v999_v22, %v1246_v34  ;;  %v539_v26 = vpop.f32.mrb[9].mxu1 }
  0xeb   :  { %v649_v25 = vmul.f32 %v1246_v34, %v411_v23  ;;  %v968_v27 = vpop.f32.mrb[10].mxu0  ;;  %v681_v29 = vmul.f32 %v1246_v34, %v539_v26  ;;  %v1000_v31 = vpop.f32.mrb[10].mxu1 }
  0xec   :  { %v722_v28 = vadd.f32 %v1251_v36, %v651_v21  ;;  %v652_v30 = vmul.f32 %v968_v27, %v1246_v34  ;;  %v414_v32 = vpop.f32.mrb[11].mxu0  ;;  %v754_v33 = vadd.f32 %v1251_v36, %v683_v24  ;;  %v684_v37 = vmul.f32 %v1000_v31, %v1246_v34  ;;  %v542_v39 = vpop.f32.mrb[11].mxu1 }
  0xed   :  { %v720_v35 = vadd.f32 %v1251_v36, %v649_v25  ;;  %v650_v38 = vmul.f32 %v1246_v34, %v414_v32  ;;  %v752_v40 = vadd.f32 %v1251_v36, %v681_v29  ;;  %v682_v42 = vmul.f32 %v1246_v34, %v542_v39 }
  0xee   :  { %786 = vst [vmem:[#allocation2 + $0x50] sm:$0xff] %v722_v28  ;;  %v723_v41 = vadd.f32 %v1251_v36, %v652_v30  ;;  %818 = vst [vmem:[#allocation2 + $0x150] sm:$0xff] %v754_v33  ;;  %v755_v43 = vadd.f32 %v1251_v36, %v684_v37 }
  0xef   :  { %784 = vst [vmem:[#allocation2 + $0x40] sm:$0xff] %v720_v35  ;;  %v721_v44 = vadd.f32 %v1251_v36, %v650_v38  ;;  %816 = vst [vmem:[#allocation2 + $0x140] sm:$0xff] %v752_v40  ;;  %v753_v45 = vadd.f32 %v1251_v36, %v682_v42 }
  0xf0   :  { %787 = vst [vmem:[#allocation2 + $0x58] sm:$0xff] %v723_v41  ;;  %819 = vst [vmem:[#allocation2 + $0x158] sm:$0xff] %v755_v43 }
  0xf1   :  { %785 = vst [vmem:[#allocation2 + $0x48] sm:$0xff] %v721_v44  ;;  %v971_v46 = vpop.f32.mrb[12].mxu0  ;;  %817 = vst [vmem:[#allocation2 + $0x148] sm:$0xff] %v753_v45  ;;  %v1003_v48 = vpop.f32.mrb[12].mxu1 }
  0xf2   :  { %v655_v47 = vmul.f32 %v971_v46, %v1246_v34  ;;  %v427_v49 = vpop.f32.mrb[13].mxu0  ;;  %v687_v50 = vmul.f32 %v1003_v48, %v1246_v34  ;;  %v555_v52 = vpop.f32.mrb[13].mxu1 }
  0xf3   :  { %v653_v51 = vmul.f32 %v1246_v34, %v427_v49  ;;  %v972_v53 = vpop.f32.mrb[14].mxu0  ;;  %v685_v55 = vmul.f32 %v1246_v34, %v555_v52  ;;  %v1004_v57 = vpop.f32.mrb[14].mxu1 }
  0xf4   :  { %v726_v54 = vadd.f32 %v1251_v36, %v655_v47  ;;  %v656_v56 = vmul.f32 %v972_v53, %v1246_v34  ;;  %v430_v58 = vpop.f32.mrb[15].mxu0  ;;  %v758_v59 = vadd.f32 %v1251_v36, %v687_v50  ;;  %v688_v61 = vmul.f32 %v1004_v57, %v1246_v34  ;;  %v558_v63 = vpop.f32.mrb[15].mxu1 }
  0xf5   :  { %v724_v60 = vadd.f32 %v1251_v36, %v653_v51  ;;  %v654_v62 = vmul.f32 %v1246_v34, %v430_v58  ;;  %v756_v0 = vadd.f32 %v1251_v36, %v685_v55  ;;  %v686_v2 = vmul.f32 %v1246_v34, %v558_v63 }
  0xf6   :  { %790 = vst [vmem:[#allocation2 + $0x70] sm:$0xff] %v726_v54  ;;  %v727_v1 = vadd.f32 %v1251_v36, %v656_v56  ;;  %822 = vst [vmem:[#allocation2 + $0x170] sm:$0xff] %v758_v59  ;;  %v759_v3 = vadd.f32 %v1251_v36, %v688_v61 }
  0xf7   :  { %788 = vst [vmem:[#allocation2 + $0x60] sm:$0xff] %v724_v60  ;;  %v725_v4 = vadd.f32 %v1251_v36, %v654_v62  ;;  %820 = vst [vmem:[#allocation2 + $0x160] sm:$0xff] %v756_v0  ;;  %v757_v5 = vadd.f32 %v1251_v36, %v686_v2 }
  0xf8   :  { %791 = vst [vmem:[#allocation2 + $0x78] sm:$0xff] %v727_v1  ;;  %823 = vst [vmem:[#allocation2 + $0x178] sm:$0xff] %v759_v3 }
  0xf9   :  { %789 = vst [vmem:[#allocation2 + $0x68] sm:$0xff] %v725_v4  ;;  %v975_v6 = vpop.f32.mrb[16].mxu0  ;;  %821 = vst [vmem:[#allocation2 + $0x168] sm:$0xff] %v757_v5  ;;  %v1007_v8 = vpop.f32.mrb[16].mxu1 }
  0xfa   :  { %v659_v7 = vmul.f32 %v975_v6, %v1246_v34  ;;  %v443_v9 = vpop.f32.mrb[17].mxu0  ;;  %v691_v10 = vmul.f32 %v1007_v8, %v1246_v34  ;;  %v571_v12 = vpop.f32.mrb[17].mxu1 }
  0xfb   :  { %v657_v11 = vmul.f32 %v1246_v34, %v443_v9  ;;  %v976_v13 = vpop.f32.mrb[18].mxu0  ;;  %v689_v15 = vmul.f32 %v1246_v34, %v571_v12  ;;  %v1008_v17 = vpop.f32.mrb[18].mxu1 }
  0xfc   :  { %v730_v14 = vadd.f32 %v1251_v36, %v659_v7  ;;  %v660_v16 = vmul.f32 %v976_v13, %v1246_v34  ;;  %v446_v18 = vpop.f32.mrb[19].mxu0  ;;  %v762_v19 = vadd.f32 %v1251_v36, %v691_v10  ;;  %v692_v21 = vmul.f32 %v1008_v17, %v1246_v34  ;;  %v574_v23 = vpop.f32.mrb[19].mxu1 }
  0xfd   :  { %v728_v20 = vadd.f32 %v1251_v36, %v657_v11  ;;  %v658_v22 = vmul.f32 %v1246_v34, %v446_v18  ;;  %v760_v24 = vadd.f32 %v1251_v36, %v689_v15  ;;  %v690_v26 = vmul.f32 %v1246_v34, %v574_v23 }
  0xfe   :  { %794 = vst [vmem:[#allocation2 + $0x90] sm:$0xff] %v730_v14  ;;  %v731_v25 = vadd.f32 %v1251_v36, %v660_v16  ;;  %826 = vst [vmem:[#allocation2 + $0x190] sm:$0xff] %v762_v19  ;;  %v763_v27 = vadd.f32 %v1251_v36, %v692_v21 }
  0xff   :  { %792 = vst [vmem:[#allocation2 + $0x80] sm:$0xff] %v728_v20  ;;  %v729_v28 = vadd.f32 %v1251_v36, %v658_v22  ;;  %824 = vst [vmem:[#allocation2 + $0x180] sm:$0xff] %v760_v24  ;;  %v761_v29 = vadd.f32 %v1251_v36, %v690_v26 }
 0x100   :  { %795 = vst [vmem:[#allocation2 + $0x98] sm:$0xff] %v731_v25  ;;  %827 = vst [vmem:[#allocation2 + $0x198] sm:$0xff] %v763_v27 }
 0x101   :  { %793 = vst [vmem:[#allocation2 + $0x88] sm:$0xff] %v729_v28  ;;  %v979_v30 = vpop.f32.mrb[20].mxu0  ;;  %825 = vst [vmem:[#allocation2 + $0x188] sm:$0xff] %v761_v29  ;;  %v1011_v32 = vpop.f32.mrb[20].mxu1 }
 0x102   :  { %v663_v31 = vmul.f32 %v979_v30, %v1246_v34  ;;  %v459_v33 = vpop.f32.mrb[21].mxu0  ;;  %v695_v35 = vmul.f32 %v1011_v32, %v1246_v34  ;;  %v587_v38 = vpop.f32.mrb[21].mxu1 }
 0x103   :  { %v661_v37 = vmul.f32 %v1246_v34, %v459_v33  ;;  %v980_v39 = vpop.f32.mrb[22].mxu0  ;;  %v693_v41 = vmul.f32 %v1246_v34, %v587_v38  ;;  %v1012_v43 = vpop.f32.mrb[22].mxu1 }
 0x104   :  { %v734_v40 = vadd.f32 %v1251_v36, %v663_v31  ;;  %v664_v42 = vmul.f32 %v980_v39, %v1246_v34  ;;  %v462_v44 = vpop.f32.mrb[23].mxu0  ;;  %v766_v45 = vadd.f32 %v1251_v36, %v695_v35  ;;  %v696_v47 = vmul.f32 %v1012_v43, %v1246_v34  ;;  %v590_v49 = vpop.f32.mrb[23].mxu1 }
 0x105   :  { %v732_v46 = vadd.f32 %v1251_v36, %v661_v37  ;;  %v662_v48 = vmul.f32 %v1246_v34, %v462_v44  ;;  %v764_v50 = vadd.f32 %v1251_v36, %v693_v41  ;;  %v694_v52 = vmul.f32 %v1246_v34, %v590_v49 }
 0x106   :  { %798 = vst [vmem:[#allocation2 + $0xb0] sm:$0xff] %v734_v40  ;;  %v735_v51 = vadd.f32 %v1251_v36, %v664_v42  ;;  %830 = vst [vmem:[#allocation2 + $0x1b0] sm:$0xff] %v766_v45  ;;  %v767_v53 = vadd.f32 %v1251_v36, %v696_v47 }
 0x107   :  { %796 = vst [vmem:[#allocation2 + $0xa0] sm:$0xff] %v732_v46  ;;  %v733_v54 = vadd.f32 %v1251_v36, %v662_v48  ;;  %828 = vst [vmem:[#allocation2 + $0x1a0] sm:$0xff] %v764_v50  ;;  %v765_v55 = vadd.f32 %v1251_v36, %v694_v52 }
 0x108   :  { %799 = vst [vmem:[#allocation2 + $0xb8] sm:$0xff] %v735_v51  ;;  %831 = vst [vmem:[#allocation2 + $0x1b8] sm:$0xff] %v767_v53 }
 0x109   :  { %797 = vst [vmem:[#allocation2 + $0xa8] sm:$0xff] %v733_v54  ;;  %v983_v56 = vpop.f32.mrb[24].mxu0  ;;  %829 = vst [vmem:[#allocation2 + $0x1a8] sm:$0xff] %v765_v55  ;;  %v1015_v58 = vpop.f32.mrb[24].mxu1 }
 0x10a   :  { %v667_v57 = vmul.f32 %v983_v56, %v1246_v34  ;;  %v475_v59 = vpop.f32.mrb[25].mxu0  ;;  %v699_v60 = vmul.f32 %v1015_v58, %v1246_v34  ;;  %v603_v62 = vpop.f32.mrb[25].mxu1 }
 0x10b   :  { %v665_v61 = vmul.f32 %v1246_v34, %v475_v59  ;;  %v984_v63 = vpop.f32.mrb[26].mxu0  ;;  %v697_v1 = vmul.f32 %v1246_v34, %v603_v62  ;;  %v1016_v3 = vpop.f32.mrb[26].mxu1 }
 0x10c   :  { %v738_v0 = vadd.f32 %v1251_v36, %v667_v57  ;;  %v668_v2 = vmul.f32 %v984_v63, %v1246_v34  ;;  %v478_v4 = vpop.f32.mrb[27].mxu0  ;;  %v770_v5 = vadd.f32 %v1251_v36, %v699_v60  ;;  %v700_v7 = vmul.f32 %v1016_v3, %v1246_v34  ;;  %v606_v9 = vpop.f32.mrb[27].mxu1 }
 0x10d   :  { %v736_v6 = vadd.f32 %v1251_v36, %v665_v61  ;;  %v666_v8 = vmul.f32 %v1246_v34, %v478_v4  ;;  %v768_v10 = vadd.f32 %v1251_v36, %v697_v1  ;;  %v698_v12 = vmul.f32 %v1246_v34, %v606_v9 }
 0x10e   :  { %802 = vst [vmem:[#allocation2 + $0xd0] sm:$0xff] %v738_v0  ;;  %v739_v11 = vadd.f32 %v1251_v36, %v668_v2  ;;  %834 = vst [vmem:[#allocation2 + $0x1d0] sm:$0xff] %v770_v5  ;;  %v771_v13 = vadd.f32 %v1251_v36, %v700_v7 }
 0x10f   :  { %800 = vst [vmem:[#allocation2 + $0xc0] sm:$0xff] %v736_v6  ;;  %v737_v14 = vadd.f32 %v1251_v36, %v666_v8  ;;  %832 = vst [vmem:[#allocation2 + $0x1c0] sm:$0xff] %v768_v10  ;;  %v769_v15 = vadd.f32 %v1251_v36, %v698_v12 }
 0x110   :  { %803 = vst [vmem:[#allocation2 + $0xd8] sm:$0xff] %v739_v11  ;;  %835 = vst [vmem:[#allocation2 + $0x1d8] sm:$0xff] %v771_v13 }
 0x111   :  { %801 = vst [vmem:[#allocation2 + $0xc8] sm:$0xff] %v737_v14  ;;  %v987_v16 = vpop.f32.mrb[28].mxu0  ;;  %833 = vst [vmem:[#allocation2 + $0x1c8] sm:$0xff] %v769_v15  ;;  %v1019_v18 = vpop.f32.mrb[28].mxu1 }
 0x112   :  { %v671_v17 = vmul.f32 %v987_v16, %v1246_v34  ;;  %v491_v19 = vpop.f32.mrb[29].mxu0  ;;  %v703_v20 = vmul.f32 %v1019_v18, %v1246_v34  ;;  %v619_v22 = vpop.f32.mrb[29].mxu1 }
 0x113   :  { %v669_v21 = vmul.f32 %v1246_v34, %v491_v19  ;;  %v988_v23 = vpop.f32.mrb[30].mxu0  ;;  %v701_v25 = vmul.f32 %v1246_v34, %v619_v22  ;;  %v1020_v27 = vpop.f32.mrb[30].mxu1 }
 0x114   :  { %v742_v24 = vadd.f32 %v1251_v36, %v671_v17  ;;  %v672_v26 = vmul.f32 %v988_v23, %v1246_v34  ;;  %v494_v28 = vpop.f32.mrb[31].mxu0  ;;  %v774_v29 = vadd.f32 %v1251_v36, %v703_v20  ;;  %v704_v31 = vmul.f32 %v1020_v27, %v1246_v34  ;;  %v622_v33 = vpop.f32.mrb[31].mxu1 }
 0x115   :  { %v740_v30 = vadd.f32 %v1251_v36, %v669_v21  ;;  %v670_v32 = vmul.f32 %v1246_v34, %v494_v28  ;;  %v772_v35 = vadd.f32 %v1251_v36, %v701_v25  ;;  %v702_v38 = vmul.f32 %v1246_v34, %v622_v33 }
 0x116   :  { %806 = vst [vmem:[#allocation2 + $0xf0] sm:$0xff] %v742_v24  ;;  %v743_v37 = vadd.f32 %v1251_v36, %v672_v26  ;;  %838 = vst [vmem:[#allocation2 + $0x1f0] sm:$0xff] %v774_v29  ;;  %v775_v39 = vadd.f32 %v1251_v36, %v704_v31 }
 0x117   :  { %804 = vst [vmem:[#allocation2 + $0xe0] sm:$0xff] %v740_v30  ;;  %v741_v40 = vadd.f32 %v1251_v36, %v670_v32  ;;  %836 = vst [vmem:[#allocation2 + $0x1e0] sm:$0xff] %v772_v35  ;;  %v773_v41 = vadd.f32 %v1251_v36, %v702_v38 }
 0x118   :  { %807 = vst [vmem:[#allocation2 + $0xf8] sm:$0xff] %v743_v37  ;;  %839 = vst [vmem:[#allocation2 + $0x1f8] sm:$0xff] %v775_v39 }
 0x119   :  { %805 = vst [vmem:[#allocation2 + $0xe8] sm:$0xff] %v741_v40  ;;  %837 = vst [vmem:[#allocation2 + $0x1e8] sm:$0xff] %v773_v41 }
 0x11a   :  { %1071 = shalt.err (!%p1068_p4)
}
 0x11b   :  { %s1072_s6 = scalar_lea.hbm %s1397_s4, 8192 }
 0x11c   :  { %p1073_p5 = scmp.ne.s32.totalorder %s1397_s4, %s1072_s6  ;;  %p1076_p6 = scmp.lt.u32.totalorder %s1072_s6, %s1397_s4 }
 0x11e   :  { %p1078_p7 = pnand %p1076_p6, %p1073_p5 }
 0x120   :  { %1081 = shalt.err (!%p1078_p7)
}
 0x121   :  { %s1085_s11 = smov 128   ;;  %s1086_s12 = smov 8  }
 0x122   :  { %851 = dma.vmem_to_hbm [thread:$0]  %s846_s2, 8192, %s1397_s4, [#allocation3], %s1085_s11, %s1085_s11, %s1086_s12  }
 0x123   :  { %1082 = dma.done.wait [#allocation3], 8192  }
 0x124   :  { %1083 = vsyncadd [#allocation3], 4294959104 }
 0x125   :  { %855 = vsyncpa [#allocation3], 1 }

</bundles_post_ra>
